<compile_context>
chip_gen: v7x
topology: tpu7x:2x2x1
jax: 0.10.0
libtpu: 0.0.40
codegen_flags: <defaults>
</compile_context>

<pallas_src>
import functools
import math

import jax
import jax.numpy as jnp
from jax import lax
from jax.experimental import pallas as pl
from jax.experimental.pallas import tpu as pltpu


# MXU-aligned tile targets.  Small dims (as in the demo shapes below) fall
# back to full-dim blocks, which are always legal; large dims are padded to a
# multiple of the tile.
_TM = 256        # activation rows per tile (sublane axis)
_TN = 512        # output features per tile (lane-dense stores)
_TK = 512        # reduction depth per tile
_TF = 512        # d_ff tile for the fused FFN kernel
_TF_CHUNK = 256  # inner chunk of the relu'd FFN intermediate
_TQ = 256        # attention: query rows per tile
_TKV = 256       # attention: key/value rows per tile (flash loop)

_COMPUTE_DTYPE = jnp.bfloat16   # MXU input dtype; accumulation stays f32


def _round_up(x, m):
    return (x + m - 1) // m * m


def _tile_and_pad(dim, target):
    """Return (tile, padded_dim).  dim <= target -> full-dim block (always
    legal); otherwise use `target` and pad the array up to a multiple."""
    if dim <= target:
        return dim, dim
    return target, _round_up(dim, target)


def _pad2d(a, rows, cols):
    r, c = a.shape
    if r == rows and c == cols:
        return a
    return jnp.pad(a, ((0, rows - r), (0, cols - c)))


def _pad_axis(a, axis, size):
    if a.shape[axis] == size:
        return a
    pads = [(0, 0)] * a.ndim
    pads[axis] = (0, size - a.shape[axis])
    return jnp.pad(a, pads)


def _row(v):
    v = v.astype(jnp.float32)
    return v if v.ndim == 2 else v.reshape(1, -1)


def _vmem_limit_bytes():
    """~75% of physical VMEM (96 MiB on v5e/v6e, 48 MiB on v7x); None if the
    query is unavailable (then we leave the compiler default alone)."""
    try:
        info = pltpu.get_tpu_info()
        cap = getattr(info, "vmem_capacity_bytes", None)
        if cap:
            return int(cap) * 3 // 4
    except Exception:
        pass
    return None


_VMEM_LIMIT = _vmem_limit_bytes()


def _compiler_params(dimension_semantics):
    kwargs = dict(dimension_semantics=dimension_semantics)
    if _VMEM_LIMIT is not None:
        kwargs["vmem_limit_bytes"] = _VMEM_LIMIT
    return pltpu.CompilerParams(**kwargs)


# ----------------------------------------------------------------------------
# Tiled linear:  (M, K) @ (K, N) + b   [optional ReLU]
# ----------------------------------------------------------------------------

def _matmul_kernel(x_ref, w_ref, b_ref, o_ref, acc_ref, *, relu):
    @pl.when(pl.program_id(2) == 0)
    def _():
        acc_ref[...] = jnp.zeros_like(acc_ref)

    acc_ref[...] += jnp.dot(x_ref[...], w_ref[...],
                            preferred_element_type=jnp.float32)

    @pl.when(pl.program_id(2) == pl.num_programs(2) - 1)
    def _():
        y = acc_ref[...] + b_ref[...]
        if relu:
            y = jnp.maximum(y, 0.0)
        o_ref[...] = y.astype(o_ref.dtype)


def linear(x2d, w, b, relu=False, out_dtype=None):
    """Tiled, pipelined matmul: bf16 MXU inputs, f32 accumulation."""
    out_dtype = out_dtype or x2d.dtype
    M, K = x2d.shape
    N = w.shape[1]
    tm, Mp = _tile_and_pad(M, _TM)
    tn, Np = _tile_and_pad(N, _TN)
    tk, Kp = _tile_and_pad(K, _TK)

    xp = _pad2d(x2d.astype(_COMPUTE_DTYPE), Mp, Kp)
    wp = _pad2d(w.astype(_COMPUTE_DTYPE), Kp, Np)
    bp = _pad2d(_row(b), 1, Np)

    cost = pl.CostEstimate(
        flops=2 * M * K * N, transcendentals=0,
        bytes_accessed=2 * (M * K + K * N)
        + M * N * jnp.dtype(out_dtype).itemsize)

    out = pl.pallas_call(
        functools.partial(_matmul_kernel, relu=relu),
        out_shape=jax.ShapeDtypeStruct((Mp, Np), out_dtype),
        grid=(Mp // tm, Np // tn, Kp // tk),
        in_specs=[
            pl.BlockSpec((tm, tk), lambda i, j, k: (i, k)),
            pl.BlockSpec((tk, tn), lambda i, j, k: (k, j)),
            pl.BlockSpec((1, tn), lambda i, j, k: (0, j)),
        ],
        out_specs=pl.BlockSpec((tm, tn), lambda i, j, k: (i, j)),
        scratch_shapes=[pltpu.VMEM((tm, tn), jnp.float32)],
        compiler_params=_compiler_params(("parallel", "parallel", "arbitrary")),
        cost_estimate=cost,
    )(xp, wp, bp)
    if (Mp, Np) != (M, N):
        out = out[:M, :N]
    return out


# ----------------------------------------------------------------------------
# Fused:  LayerNorm((x @ w + b) + residual)   (matmul epilogue does add+LN)
# ----------------------------------------------------------------------------

def _matmul_add_ln_kernel(x_ref, w_ref, b_ref, r_ref, g_ref, bt_ref, o_ref,
                          acc_ref, *, eps):
    @pl.when(pl.program_id(1) == 0)
    def _():
        acc_ref[...] = jnp.zeros_like(acc_ref)

    acc_ref[...] += jnp.dot(x_ref[...], w_ref[...],
                            preferred_element_type=jnp.float32)

    @pl.when(pl.program_id(1) == pl.num_programs(1) - 1)
    def _():
        y = acc_ref[...] + b_ref[...] + r_ref[...].astype(jnp.float32)
        mu = jnp.mean(y, axis=-1, keepdims=True)
        var = jnp.mean(jnp.square(y - mu), axis=-1, keepdims=True)
        yhat = (y - mu) * lax.rsqrt(var + eps)
        o_ref[...] = (yhat * g_ref[...] + bt_ref[...]).astype(o_ref.dtype)


def linear_add_layernorm(x2d, w, b, res2d, gamma, beta, eps=1e-5,
                         out_dtype=None):
    """Output projection fused with residual add + LayerNorm.  N (= d_model)
    stays a single lane-dense block so row statistics are in-kernel."""
    out_dtype = out_dtype or x2d.dtype
    M, K = x2d.shape
    N = w.shape[1]
    tm_target = _TM if N < 8192 else 128   # v7x VMEM headroom at huge d_model
    tm, Mp = _tile_and_pad(M, tm_target)
    tk, Kp = _tile_and_pad(K, _TK)

    xp = _pad2d(x2d.astype(_COMPUTE_DTYPE), Mp, Kp)
    wp = _pad2d(w.astype(_COMPUTE_DTYPE), Kp, N)
    rp = _pad2d(res2d.astype(_COMPUTE_DTYPE), Mp, N)
    bp, gp, btp = _row(b), _row(gamma), _row(beta)

    cost = pl.CostEstimate(
        flops=2 * M * K * N + 10 * M * N, transcendentals=M,
        bytes_accessed=2 * (M * K + K * N + 2 * M * N))

    out = pl.pallas_call(
        functools.partial(_matmul_add_ln_kernel, eps=eps),
        out_shape=jax.ShapeDtypeStruct((Mp, N), out_dtype),
        grid=(Mp // tm, Kp // tk),
        in_specs=[
            pl.BlockSpec((tm, tk), lambda i, k: (i, k)),
            pl.BlockSpec((tk, N), lambda i, k: (k, 0)),
            pl.BlockSpec((1, N), lambda i, k: (0, 0)),
            pl.BlockSpec((tm, N), lambda i, k: (i, 0)),
            pl.BlockSpec((1, N), lambda i, k: (0, 0)),
            pl.BlockSpec((1, N), lambda i, k: (0, 0)),
        ],
        out_specs=pl.BlockSpec((tm, N), lambda i, k: (i, 0)),
        scratch_shapes=[pltpu.VMEM((tm, N), jnp.float32)],
        compiler_params=_compiler_params(("parallel", "arbitrary")),
        cost_estimate=cost,
    )(xp, wp, bp, rp, gp, btp)
    if Mp != M:
        out = out[:M]
    return out


# ----------------------------------------------------------------------------
# Fused FFN:  LayerNorm(relu(x@w1+b1) @ w2 + b2 + residual)
# The (M, d_ff) intermediate lives only in VMEM (tiled over d_ff in-grid, and
# chunked inside the kernel so the relu'd slab stays small).
# ----------------------------------------------------------------------------

def _ffn_add_ln_kernel(x_ref, w1_ref, b1_ref, w2_ref, b2_ref, r_ref, g_ref,
                       bt_ref, o_ref, acc_ref, *, eps, chunk):
    @pl.when(pl.program_id(1) == 0)
    def _():
        acc_ref[...] = jnp.zeros_like(acc_ref)

    x = x_ref[...]
    tf = w1_ref.shape[1]
    for c in range(0, tf, chunk):
        h = jnp.dot(x, w1_ref[:, c:c + chunk],
                    preferred_element_type=jnp.float32)
        h = jnp.maximum(h + b1_ref[:, c:c + chunk], 0.0)
        acc_ref[...] += jnp.dot(h.astype(x.dtype), w2_ref[c:c + chunk, :],
                                preferred_element_type=jnp.float32)

    @pl.when(pl.program_id(1) == pl.num_programs(1) - 1)
    def _():
        y = acc_ref[...] + b2_ref[...] + r_ref[...].astype(jnp.float32)
        mu = jnp.mean(y, axis=-1, keepdims=True)
        var = jnp.mean(jnp.square(y - mu), axis=-1, keepdims=True)
        yhat = (y - mu) * lax.rsqrt(var + eps)
        o_ref[...] = (yhat * g_ref[...] + bt_ref[...]).astype(o_ref.dtype)


def ffn_add_layernorm(x2d, w1, b1, w2, b2, res2d, gamma, beta, eps=1e-5,
                      out_dtype=None):
    out_dtype = out_dtype or x2d.dtype
    M, D = x2d.shape
    F = w1.shape[1]
    tm, Mp = _tile_and_pad(M, _TM)
    tf, Fp = _tile_and_pad(F, _TF)
    chunk = _TF_CHUNK if tf % _TF_CHUNK == 0 else tf

    xp = _pad2d(x2d.astype(_COMPUTE_DTYPE), Mp, D)
    w1p = _pad2d(w1.astype(_COMPUTE_DTYPE), D, Fp)
    b1p = _pad2d(_row(b1), 1, Fp)
    w2p = _pad2d(w2.astype(_COMPUTE_DTYPE), Fp, D)
    rp = _pad2d(res2d.astype(_COMPUTE_DTYPE), Mp, D)
    b2p, gp, btp = _row(b2), _row(gamma), _row(beta)

    cost = pl.CostEstimate(
        flops=4 * M * D * F + 10 * M * D, transcendentals=M,
        bytes_accessed=2 * (3 * M * D + 2 * D * F))

    out = pl.pallas_call(
        functools.partial(_ffn_add_ln_kernel, eps=eps, chunk=chunk),
        out_shape=jax.ShapeDtypeStruct((Mp, D), out_dtype),
        grid=(Mp // tm, Fp // tf),
        in_specs=[
            pl.BlockSpec((tm, D), lambda i, f: (i, 0)),
            pl.BlockSpec((D, tf), lambda i, f: (0, f)),
            pl.BlockSpec((1, tf), lambda i, f: (0, f)),
            pl.BlockSpec((tf, D), lambda i, f: (f, 0)),
            pl.BlockSpec((1, D), lambda i, f: (0, 0)),
            pl.BlockSpec((tm, D), lambda i, f: (i, 0)),
            pl.BlockSpec((1, D), lambda i, f: (0, 0)),
            pl.BlockSpec((1, D), lambda i, f: (0, 0)),
        ],
        out_specs=pl.BlockSpec((tm, D), lambda i, f: (i, 0)),
        scratch_shapes=[pltpu.VMEM((tm, D), jnp.float32)],
        compiler_params=_compiler_params(("parallel", "arbitrary")),
        cost_estimate=cost,
    )(xp, w1p, b1p, w2p, b2p, rp, gp, btp)
    if Mp != M:
        out = out[:M]
    return out


# ----------------------------------------------------------------------------
# Flash attention: grid=(B, q_tiles, kv_tiles), online softmax over kv tiles,
# causal + key-padding mask generated in-kernel, heads kept packed on the
# lane axis of the output (single lane-dense (tq, H*dh) store).
# ----------------------------------------------------------------------------

def _flash_attn_kernel(q_ref, k_ref, v_ref, o_ref, m_sc, l_sc, acc_sc, *,
                       scale, causal, sk_real, tq, tkv, n_heads):
    qi = pl.program_id(1)
    ki = pl.program_id(2)

    @pl.when(ki == 0)
    def _():
        m_sc[...] = jnp.full(m_sc.shape, -1e30, dtype=m_sc.dtype)
        l_sc[...] = jnp.zeros_like(l_sc)
        acc_sc[...] = jnp.zeros_like(acc_sc)

    def _update():
        k_glob = ki * tkv + lax.broadcasted_iota(jnp.int32, (tq, tkv), 1)
        valid = k_glob < sk_real
        if causal:
            q_glob = qi * tq + lax.broadcasted_iota(jnp.int32, (tq, tkv), 0)
            valid = jnp.logical_and(valid, k_glob <= q_glob)
        for h in range(n_heads):
            qh = q_ref[0, :, h, :]              # (tq, dh)  bf16
            kh = k_ref[0, :, h, :]              # (tkv, dh) bf16
            vh = v_ref[0, :, h, :]              # (tkv, dh) bf16
            s = lax.dot_general(
                qh, kh, (((1,), (1,)), ((), ())),
                preferred_element_type=jnp.float32) * scale   # (tq, tkv)
            s = jnp.where(valid, s, -1e30)
            m_prev = m_sc[h]                                    # (tq, 1)
            m_new = jnp.maximum(m_prev, jnp.max(s, axis=-1, keepdims=True))
            alpha = jnp.exp(m_prev - m_new)
            p = jnp.exp(s - m_new)
            l_sc[h] = alpha * l_sc[h] + jnp.sum(p, axis=-1, keepdims=True)
            acc_sc[h] = alpha * acc_sc[h] + jnp.dot(
                p.astype(vh.dtype), vh, preferred_element_type=jnp.float32)
            m_sc[h] = m_new

    if causal:
        # Skip kv tiles that lie entirely above the causal diagonal.
        pl.when(ki * tkv <= qi * tq + (tq - 1))(_update)
    else:
        _update()

    @pl.when(ki == pl.num_programs(2) - 1)
    def _():
        outs = []
        for h in range(n_heads):
            l = jnp.maximum(l_sc[h], 1e-30)
            outs.append(acc_sc[h] * pl.reciprocal(l, approx=True))
        # heads side-by-side -> one lane-dense (tq, H*dh) store
        o_ref[0] = jnp.concatenate(outs, axis=-1).astype(o_ref.dtype)


def flash_attention(q, k, v, *, causal):
    """q: (B, Sq, H, dh); k/v: (B, Skv, H, dh)  ->  (B, Sq, H*dh).
    Inputs are metadata-only reshapes of the projection outputs (no XLA
    transposes); the (H, Sq, Skv) score block is never materialized."""
    B, Sq, H, dh = q.shape
    Skv = k.shape[1]
    D = H * dh
    scale = 1.0 / math.sqrt(dh)

    tq, Sq_p = _tile_and_pad(Sq, _TQ)
    tkv, Sk_p = _tile_and_pad(Skv, _TKV)
    q = _pad_axis(q, 1, Sq_p)
    k = _pad_axis(k, 1, Sk_p)
    v = _pad_axis(v, 1, Sk_p)

    cost = pl.CostEstimate(
        flops=4 * B * H * Sq * Skv * dh,
        transcendentals=B * H * Sq * Skv,
        bytes_accessed=2 * (2 * B * Sq * D + 2 * B * Skv * D))

    out = pl.pallas_call(
        functools.partial(_flash_attn_kernel, scale=scale, causal=causal,
                          sk_real=Skv, tq=tq, tkv=tkv, n_heads=H),
        out_shape=jax.ShapeDtypeStruct((B, Sq_p, D), q.dtype),
        grid=(B, Sq_p // tq, Sk_p // tkv),
        in_specs=[
            pl.BlockSpec((1, tq, H, dh), lambda b, qi, ki: (b, qi, 0, 0)),
            pl.BlockSpec((1, tkv, H, dh), lambda b, qi, ki: (b, ki, 0, 0)),
            pl.BlockSpec((1, tkv, H, dh), lambda b, qi, ki: (b, ki, 0, 0)),
        ],
        out_specs=pl.BlockSpec((1, tq, D), lambda b, qi, ki: (b, qi, 0)),
        scratch_shapes=[
            pltpu.VMEM((H, tq, 1), jnp.float32),     # running max
            pltpu.VMEM((H, tq, 1), jnp.float32),     # running denom
            pltpu.VMEM((H, tq, dh), jnp.float32),    # running numerator
        ],
        compiler_params=_compiler_params(("parallel", "parallel", "arbitrary")),
        cost_estimate=cost,
    )(q, k, v)
    if Sq_p != Sq:
        out = out[:, :Sq]
    return out


# ----------------------------------------------------------------------------
# Model (plain-JAX glue calling the Pallas kernels)
# ----------------------------------------------------------------------------

def attention_block(p, q_src2d, kv_src2d, B, Sq, Skv, n_heads, causal,
                    res2d, gamma, beta):
    D = q_src2d.shape[1]
    dh = D // n_heads
    q = linear(q_src2d, p["wq"], p["bq"], out_dtype=_COMPUTE_DTYPE)
    k = linear(kv_src2d, p["wk"], p["bk"], out_dtype=_COMPUTE_DTYPE)
    v = linear(kv_src2d, p["wv"], p["bv"], out_dtype=_COMPUTE_DTYPE)
    o = flash_attention(q.reshape(B, Sq, n_heads, dh),
                        k.reshape(B, Skv, n_heads, dh),
                        v.reshape(B, Skv, n_heads, dh),
                        causal=causal)                       # (B, Sq, D)
    # output projection fused with residual add + LayerNorm
    return linear_add_layernorm(o.reshape(B * Sq, D), p["wo"], p["bo"],
                                res2d, gamma, beta, out_dtype=_COMPUTE_DTYPE)


def decoder_layer(p, x2d, ctx2d, B, S, Sk, n_heads):
    # masked self-attention  -> +residual -> norm1  (add+LN fused into wo proj)
    x2d = attention_block(p["self_att"], x2d, x2d, B, S, S, n_heads, True,
                          x2d, p["norm1_g"], p["norm1_b"])
    # cross-attention        -> +residual -> norm2
    x2d = attention_block(p["cross_att"], x2d, ctx2d, B, S, Sk, n_heads, False,
                          x2d, p["norm2_g"], p["norm2_b"])
    # feed-forward           -> +residual -> norm3  (single fused kernel)
    ff = p["ff"]
    x2d = ffn_add_layernorm(x2d, ff["w1"], ff["b1"], ff["w2"], ff["b2"],
                            x2d, p["norm3_g"], p["norm3_b"],
                            out_dtype=_COMPUTE_DTYPE)
    return x2d


def sinusoidal_pe(seq_len, d_model):
    pos = jnp.arange(seq_len, dtype=jnp.float32)[:, None]
    i = jnp.arange(d_model // 2, dtype=jnp.float32)[None, :]
    angle = pos / jnp.power(10000.0, 2.0 * i / d_model)
    pe = jnp.zeros((seq_len, d_model), jnp.float32)
    pe = pe.at[:, 0::2].set(jnp.sin(angle))
    pe = pe.at[:, 1::2].set(jnp.cos(angle))
    return pe


def decoder_forward(params, tokens, context, n_heads):
    B, S = tokens.shape
    D = params["tok_emb"].shape[1]
    Sk = context.shape[1]
    # InputEmbedding: token embedding (scaled) + sinusoidal positional encoding.
    # TODO(synk): embedding gather / PE stay in plain JAX (not a compute hot path).
    x = jnp.take(params["tok_emb"], tokens, axis=0) * math.sqrt(D)
    x = x + sinusoidal_pe(S, D)[None, :, :]
    x2d = x.reshape(B * S, D).astype(_COMPUTE_DTYPE)
    ctx2d = context.reshape(B * Sk, D).astype(_COMPUTE_DTYPE)
    for lp in params["layers"]:
        x2d = decoder_layer(lp, x2d, ctx2d, B, S, Sk, n_heads)
    # final vocab projection (tiled over M / vocab / D)
    n_tokens = params["fc_w"].shape[1]
    out = linear(x2d, params["fc_w"], params["fc_b"], out_dtype=jnp.float32)
    return out.reshape(B, S, n_tokens)


# ----------------------------------------------------------------------------
# Deterministic parameter initialization (weights bf16, biases/LN params as
# (1, N) f32 so the hot-path wrappers do no casting/reshaping).
# ----------------------------------------------------------------------------

def init_params(key, n_layers, n_tokens, n_heads, d_model):
    d_ff = 4 * d_model
    keys = iter(jax.random.split(key, 4 + n_layers * 12))

    def dense(fan_in, fan_out):
        s = 1.0 / math.sqrt(fan_in)
        w = jax.random.uniform(next(keys), (fan_in, fan_out), jnp.float32, -s, s)
        return w.astype(_COMPUTE_DTYPE)

    def zeros_row(n):
        return jnp.zeros((1, n), jnp.float32)

    def ones_row(n):
        return jnp.ones((1, n), jnp.float32)

    def att_params():
        return {
            "wq": dense(d_model, d_model), "bq": zeros_row(d_model),
            "wk": dense(d_model, d_model), "bk": zeros_row(d_model),
            "wv": dense(d_model, d_model), "bv": zeros_row(d_model),
            "wo": dense(d_model, d_model), "bo": zeros_row(d_model),
        }

    layers = []
    for _ in range(n_layers):
        layers.append({
            "self_att": att_params(),
            "cross_att": att_params(),
            "norm1_g": ones_row(d_model), "norm1_b": zeros_row(d_model),
            "norm2_g": ones_row(d_model), "norm2_b": zeros_row(d_model),
            "norm3_g": ones_row(d_model), "norm3_b": zeros_row(d_model),
            "ff": {
                "w1": dense(d_model, d_ff), "b1": zeros_row(d_ff),
                "w2": dense(d_ff, d_model), "b2": zeros_row(d_model),
            },
        })
    return {
        "tok_emb": jax.random.normal(next(keys), (n_tokens, d_model),
                                     jnp.float32) * 0.02,
        "layers": layers,
        "fc_w": dense(d_model, n_tokens),
        "fc_b": zeros_row(n_tokens),
    }


# ----------------------------------------------------------------------------
# Main
# ----------------------------------------------------------------------------

if __name__ == "__main__":
    B, S_trg, S_src = 2, 8, 8
    n_layers, n_tokens, n_heads, d_model = 2, 16, 4, 32

    key = jax.random.PRNGKey(0)
    k_p, k_tok, k_ctx = jax.random.split(key, 3)

    params = init_params(k_p, n_layers, n_tokens, n_heads, d_model)

    tokens = jax.random.randint(k_tok, (B, S_trg), 0, n_tokens, dtype=jnp.int32)
    context = jax.random.normal(k_ctx, (B, S_src, d_model), jnp.float32)

    # trg_mask = causal (generated in-kernel); src_trg_mask = None (no masking).
    out = decoder_forward(params, tokens, context, n_heads)
    out = jax.block_until_ready(out)
    assert out.shape == (B, S_trg, n_tokens)
    assert bool(jnp.all(jnp.isfinite(out)))
    print("KERNEL_OK")
</pallas_src>

<mosaic_0001>
module attributes {stable_mosaic.version = 11 : i64} {
  func.func @_matmul_kernel(%arg0: i32, %arg1: i32, %arg2: i32, %arg3: memref<16x32xbf16, #tpu.memory_space<vmem>>, %arg4: memref<32x32xbf16, #tpu.memory_space<vmem>>, %arg5: memref<1x32xf32, #tpu.memory_space<vmem>>, %arg6: memref<16x32xbf16, #tpu.memory_space<vmem>>, %arg7: memref<16x32xf32, #tpu.memory_space<vmem>>) attributes {dimension_semantics = [#tpu.dimension_semantics<parallel>, #tpu.dimension_semantics<parallel>, #tpu.dimension_semantics<arbitrary>], iteration_bounds = array<i64: 1, 1, 1>, scalar_prefetch = 0 : i64, scratch_operands = 1 : i64, tpu.core_type = #tpu.core_type<tc>, window_params = [{transform_indices = @transform_0, window_bounds = array<i64: 16, 32>}, {transform_indices = @transform_1, window_bounds = array<i64: 32, 32>}, {transform_indices = @transform_2, window_bounds = array<i64: 1, 32>}, {transform_indices = @transform_3, window_bounds = array<i64: 16, 32>}]} {
    %c0_i32 = arith.constant 0 : i32
    %0 = arith.cmpi eq, %arg2, %c0_i32 : i32
    %1 = arith.extui %0 : i1 to i32
    %c0_i32_0 = arith.constant 0 : i32
    %2 = arith.cmpi ne, %1, %c0_i32_0 : i32
    scf.if %2 {
      %cst_10 = arith.constant 0.000000e+00 : f32
      %12 = vector.broadcast %cst_10 : f32 to vector<16x32xf32>
      %c0_11 = arith.constant 0 : index
      %c0_12 = arith.constant 0 : index
      %13 = vector.load %arg7[%c0_11, %c0_12] : memref<16x32xf32, #tpu.memory_space<vmem>>, vector<16x32xf32>
      tpu.vector_store %arg7[%c0_11, %c0_12], %12 {strides = array<i32>} : memref<16x32xf32, #tpu.memory_space<vmem>>, vector<16x32xf32>,
    } else {
    }
    %c0 = arith.constant 0 : index
    %c0_1 = arith.constant 0 : index
    %3 = vector.load %arg7[%c0, %c0_1] : memref<16x32xf32, #tpu.memory_space<vmem>>, vector<16x32xf32>
    %c0_2 = arith.constant 0 : index
    %c0_3 = arith.constant 0 : index
    %4 = vector.load %arg3[%c0_2, %c0_3] : memref<16x32xbf16, #tpu.memory_space<vmem>>, vector<16x32xbf16>
    %c0_4 = arith.constant 0 : index
    %c0_5 = arith.constant 0 : index
    %5 = vector.load %arg4[%c0_4, %c0_5] : memref<32x32xbf16, #tpu.memory_space<vmem>>, vector<32x32xbf16>
    %cst = arith.constant dense<0.000000e+00> : vector<16x32xf32>
    %6 = tpu.matmul %4, %5, %cst {dimension_numbers = #tpu.dot_dimension_numbers<[1], [0], [0], [1], [0, 0, 1, 1], [], []>} : vector<16x32xbf16>, vector<32x32xbf16>, vector<16x32xf32> -> vector<16x32xf32>
    %7 = arith.addf %3, %6 : vector<16x32xf32>
    %c0_6 = arith.constant 0 : index
    %c0_7 = arith.constant 0 : index
    %8 = vector.load %arg7[%c0_6, %c0_7] : memref<16x32xf32, #tpu.memory_space<vmem>>, vector<16x32xf32>
    tpu.vector_store %arg7[%c0_6, %c0_7], %7 {strides = array<i32>} : memref<16x32xf32, #tpu.memory_space<vmem>>, vector<16x32xf32>,
    %c0_i32_8 = arith.constant 0 : i32
    %9 = arith.cmpi eq, %arg2, %c0_i32_8 : i32
    %10 = arith.extui %9 : i1 to i32
    %c0_i32_9 = arith.constant 0 : i32
    %11 = arith.cmpi ne, %10, %c0_i32_9 : i32
    scf.if %11 {
      %c0_10 = arith.constant 0 : index
      %c0_11 = arith.constant 0 : index
      %12 = vector.load %arg7[%c0_10, %c0_11] : memref<16x32xf32, #tpu.memory_space<vmem>>, vector<16x32xf32>
      %c0_12 = arith.constant 0 : index
      %c0_13 = arith.constant 0 : index
      %13 = vector.load %arg5[%c0_12, %c0_13] : memref<1x32xf32, #tpu.memory_space<vmem>>, vector<1x32xf32>
      %14 = vector.broadcast %13 : vector<1x32xf32> to vector<16x32xf32>
      %15 = arith.addf %12, %14 : vector<16x32xf32>
      %16 = arith.truncf %15 : vector<16x32xf32> to vector<16x32xbf16>
      %c0_14 = arith.constant 0 : index
      %c0_15 = arith.constant 0 : index
      %17 = vector.load %arg6[%c0_14, %c0_15] : memref<16x32xbf16, #tpu.memory_space<vmem>>, vector<16x32xbf16>
      tpu.vector_store %arg6[%c0_14, %c0_15], %16 {strides = array<i32>} : memref<16x32xbf16, #tpu.memory_space<vmem>>, vector<16x32xbf16>,
    } else {
    }
    return
  }
  func.func @transform_0(%arg0: i32, %arg1: i32, %arg2: i32) -> (i32, i32) {
    %c0_i32 = arith.constant 0 : i32
    return %arg0, %arg2 : i32, i32
  }
  func.func @transform_1(%arg0: i32, %arg1: i32, %arg2: i32) -> (i32, i32) {
    %c0_i32 = arith.constant 0 : i32
    return %arg2, %arg1 : i32, i32
  }
  func.func @transform_2(%arg0: i32, %arg1: i32, %arg2: i32) -> (i32, i32) {
    %c0_i32 = arith.constant 0 : i32
    %c0_i32_0 = arith.constant 0 : i32
    return %c0_i32, %arg1 : i32, i32
  }
  func.func @transform_3(%arg0: i32, %arg1: i32, %arg2: i32) -> (i32, i32) {
    %c0_i32 = arith.constant 0 : i32
    return %arg0, %arg1 : i32, i32
  }
}

</mosaic_0001>

<bundles_post_ra>
// kernel: tpu_custom_call.1
= control target key start
LH: loop header
LB: loop body
LE: loop exit
PB: predicated region body
PF: predicated region fallthrough
CT: control target
= control target key end

     0   :  { %8 = vsyncpa [#allocation4], 0  ;;  %s350_s0 = inlined_call_operand.hbm [shape: bf16[16,32], index: 0, kind: input, shape index: {}]   ;;  %s351_s1 = inlined_call_operand.hbm [shape: bf16[32,32], index: 1, kind: input, shape index: {}]   ;;  %s352_s2 = inlined_call_operand.vmem [shape: f32[1,32], index: 2, kind: input, shape index: {}]   ;;  %s353_s3 = inlined_call_operand.hbm [shape: bf16[16,32], index: 3, kind: output, shape index: {}]  }
   0x1   :  { %9 = vsyncpa [#allocation7], 0 }
   0x2   :  { %10 = vsyncpa [#allocation5], 0  ;;  %s270_s12 = smov [#allocation3]   ;;  %s198_s16 = scalar_lea.hbm %s350_s0, 128 }
   0x3   :  { %s16_s13 = sshll.u32 %s270_s12, 4  ;;  %p199_p0 = scmp.ne.s32.totalorder %s350_s0, %s198_s16  ;;  %s17_s13 = int_to_ptr.vmem [resolvable:$true] %s16_s13 }
   0x4   :  { %p202_p1 = scmp.lt.u32.totalorder %s198_s16, %s350_s0 }
   0x6   :  { %p204_p2 = pnand %p202_p1, %p199_p0 }
   0x8   :  { %207 = shalt.err (!%p204_p2)
}
   0x9   :  { %s208_s21 = scalar_lea.vmem %s17_s13, 128  ;;  %p213_p4 = scmp.lt.s32.totalorder %s17_s13, %s17_s13 }
   0xa   :  { %p209_p3 = scmp.ne.s32.totalorder %s17_s13, %s208_s21  ;;  %p214_p5 = scmp.lt.s32.totalorder %s208_s21, %s208_s21 }
   0xc   :  { %p215_p6 = por %p214_p5, %p213_p4 }
   0xe   :  { %p216_p7 = pnand %p215_p6, %p209_p3 }
  0x10   :  { %219 = shalt.err (!%p216_p7)
}
  0x11   :  { %s271_s22 = smov 64   ;;  %s272_s23 = smov 4  }
  0x12   :  { %22 = dma.hbm_to_vmem [thread:$0]  %s350_s0, 128, %s17_s13, [#allocation4], %s271_s22, %s271_s22, %s272_s23  }
  0x13   :  { %s273_s26 = smov [#allocation6]   ;;  %s220_s30 = scalar_lea.hbm %s351_s1, 256 }
  0x14   :  { %s28_s27 = sshll.u32 %s273_s26, 4  ;;  %p221_p8 = scmp.ne.s32.totalorder %s351_s1, %s220_s30  ;;  %s29_s27 = int_to_ptr.vmem [resolvable:$true] %s28_s27 }
  0x15   :  { %p224_p9 = scmp.lt.u32.totalorder %s220_s30, %s351_s1 }
  0x17   :  { %p226_p10 = pnand %p224_p9, %p221_p8 }
  0x19   :  { %229 = shalt.err (!%p226_p10)
}
  0x1a   :  { %s230_s8 = scalar_lea.vmem %s29_s27, 256  ;;  %p235_p12 = scmp.lt.s32.totalorder %s29_s27, %s29_s27 }
  0x1b   :  { %p231_p11 = scmp.ne.s32.totalorder %s29_s27, %s230_s8  ;;  %p236_p13 = scmp.lt.s32.totalorder %s230_s8, %s230_s8 }
  0x1d   :  { %p237_p0 = por %p236_p13, %p235_p12 }
  0x1f   :  { %p238_p1 = pnand %p237_p0, %p231_p11 }
  0x21   :  { %241 = shalt.err (!%p238_p1)
}
  0x22   :  { %34 = dma.hbm_to_vmem [thread:$0]  %s351_s1, 256, %s29_s27, [#allocation7], %s271_s22, %s271_s22, %s272_s23  }
  0x23   :  { %264 = dma.done.wait [#allocation4], 128  }
  0x24   :  { %265 = vsyncadd [#allocation4], 4294967168 }
  0x25   :  { %266 = dma.done.wait [#allocation7], 256  }
  0x26   :  { %267 = vsyncadd [#allocation7], 4294967040  ;;  %vm48_vm0 = vcmask 261120   ;;  %v274_v0 = vmov 0.0   ;;  %vm275_vm1 = vmmov 0   ;;  %v195_v1 = vld [vmem:[#allocation6] sm:$0xff]  }
  0x27   :  { %180 = vmatprep.subr.bf16.mxu0 %v274_v0  ;;  %184 = vmatprep.mubr.msk.bf16.mxu0 %vm275_vm1, %v274_v0  ;;  %49 = vst.msk [vmem:[#allocation2] sm:$0xff] %vm48_vm0, %v274_v0  ;;  %50 = vst.msk [vmem:[#allocation2 + $0x8] sm:$0xff] %vm48_vm0, %v274_v0  ;;  %v196_v2 = vld [vmem:[#allocation6 + $0x8] sm:$0xff]   ;;  %v197_v3 = vld [vmem:[#allocation3] sm:$0xff]   ;;  %vm147_vm2 = vcmask 257024   ;;  %s276_s11 = smov [#allocation8]  }
  0x28   :  { %181 = vmatpush3.bf16.msra.mxu0 %v195_v1  ;;  %v172_v12 = vld [vmem:[%s352_s2] ss:$0 sm:$0xff]  ;;  %s155_s12 = sshll.u32 %s276_s11, 4  ;;  %s156_s12 = int_to_ptr.vmem [resolvable:$true] %s155_s12 }
  0x29   :  { %182 = vmatprep.subr.bf16.mxu0 %v274_v0  ;;  %s242_s13 = scalar_lea.vmem %s156_s12, 128  ;;  %p247_p3 = scmp.lt.s32.totalorder %s156_s12, %s156_s12 }
  0x2a   :  { %p243_p2 = scmp.ne.s32.totalorder %s156_s12, %s242_s13  ;;  %p248_p4 = scmp.lt.s32.totalorder %s242_s13, %s242_s13 }
  0x2c   :  { %183 = vmatpush3.bf16.msra.mxu0 %v196_v2  ;;  %p249_p5 = por %p248_p4, %p247_p3 }
  0x2e   :  { %v51_v4 = vld [vmem:[#allocation2] sm:$0xff]  ;;  %v52_v6 = vld [vmem:[#allocation2 + $0x8] sm:$0xff]  ;;  %p250_p6 = pnand %p249_p5, %p243_p2 }
  0x2f   :  { %185 = vmatmul.mubr.msk.bf16.vlgmr.msra.gmra.mrb[0].mxu0 %vm48_vm0, %v197_v3 }
 0x102   :  { %v114_v5 = vpop.f32.mrb[0].mxu0 }
 0x103   :  { %v121_v7 = vadd.f32 %v114_v5, %v51_v4  ;;  %v186_v8 = vpop.f32.mrb[1].mxu0 }
 0x104   :  { %v117_v9 = vpop.f32.mrb[2].mxu0 }
 0x105   :  { %123 = vst.msk [vmem:[#allocation2] sm:$0xff] %vm48_vm0, %v121_v7  ;;  %v122_v10 = vadd.f32 %v117_v9, %v52_v6  ;;  %v187_v11 = vpop.f32.mrb[3].mxu0 }
 0x107   :  { %124 = vst.msk [vmem:[#allocation2 + $0x8] sm:$0xff] %vm48_vm0, %v122_v10 }
 0x10c   :  { %v128_v13 = vld [vmem:[#allocation2] sm:$0xff] }
 0x10d   :  { %v137_v14 = vadd.f32 %v172_v12, %v128_v13 }
 0x10e   :  { %v129_v15 = vld [vmem:[#allocation2 + $0x8] sm:$0xff] }
 0x10f   :  { %v138_v16 = vadd.f32 %v172_v12, %v129_v15  ;;  %v175_v17 = vpack.c.bf16 %v137_v14, %v137_v14 }
 0x111   :  { %v176_v18 = vpack.c.bf16 %v138_v16, %v138_v16  ;;  %148 = vst.msk [vmem:[#allocation8] sm:$0xf] %vm147_vm2, %v175_v17 }
 0x113   :  { %149 = vst.msk [vmem:[#allocation8 + $0x4] sm:$0xf] %vm147_vm2, %v176_v18 }
 0x114   :  { %253 = shalt.err (!%p250_p6)
}
 0x115   :  { %s254_s15 = scalar_lea.hbm %s353_s3, 128 }
 0x116   :  { %p255_p7 = scmp.ne.s32.totalorder %s353_s3, %s254_s15  ;;  %p258_p8 = scmp.lt.u32.totalorder %s254_s15, %s353_s3 }
 0x118   :  { %p260_p9 = pnand %p258_p8, %p255_p7 }
 0x11a   :  { %263 = shalt.err (!%p260_p9)
}
 0x11b   :  { %161 = dma.vmem_to_hbm [thread:$0]  %s156_s12, 128, %s353_s3, [#allocation5], %s271_s22, %s271_s22, %s272_s23  }
 0x11c   :  { %268 = dma.done.wait [#allocation5], 128  }
 0x11d   :  { %269 = vsyncadd [#allocation5], 4294967168 }
 0x11e   :  { %165 = vsyncpa [#allocation4], 1 }
 0x11f   :  { %166 = vsyncpa [#allocation7], 1 }
 0x120   :  { %167 = vsyncpa [#allocation5], 1 }

</bundles_post_ra>
